<compile_context>
chip_gen: v7x
topology: tpu7x:2x2x1
jax: 0.10.0
libtpu: 0.0.40
codegen_flags: <defaults>
</compile_context>

<pallas_src>
import jax
import jax.numpy as jnp
from jax.experimental import pallas as pl
from jax.experimental.pallas import tpu as pltpu

_LANE = 128   # lane width: pad channels up to a multiple of this
_TB = 8       # timesteps per grid step (sublane-aligned popped/x tiles)


def _make_stream_kernel(T, L, TB):
    """Kernel processing TB timesteps per grid step with a VMEM-resident queue."""
    guard_tail = (T % TB) != 0

    def kernel(x_ref, qinit_ref, popped_ref, qwork_ref):
        # x_ref:      (TB, Cp)     inputs for this block of timesteps
        # qinit_ref:  (L, 1, Cp)   initial queue state (constant block index)
        # popped_ref: (TB, Cp)     popped outputs for this block of timesteps
        # qwork_ref:  (L, 1, Cp)   queue working state; constant block index =>
        #                          stays resident in VMEM across the whole grid
        tb = pl.program_id(0)

        @pl.when(tb == 0)
        def _init():
            qwork_ref[...] = qinit_ref[...]

        # Static unroll over the TB timesteps in this block.
        for j in range(TB):
            t = tb * TB + j  # global timestep (traced scalar)

            def _step(j=j, t=t):
                # head at step t is (-t) mod L; the oldest element lives at
                # (head - 1) mod L = L - 1 - (t mod L).
                pop_idx = (L - 1) - (t % L)
                popped_ref[pl.ds(j, 1), :] = qwork_ref[pop_idx]   # pop oldest
                qwork_ref[pop_idx] = x_ref[pl.ds(j, 1), :]        # appendleft x

            if guard_tail:
                pl.when(t < T)(_step)   # skip padded tail timesteps
            else:
                _step()

        # No explicit finalize: qwork's block index never changes, so Pallas
        # writes the (rotated) queue state back to HBM once, after the last
        # grid step.  Un-rotation (static shift) happens in the wrapper.

    return kernel


def convolution_queue_stream(xs, queue):
    """Run T ConvolutionQueue.forward steps in one fused Pallas kernel.

    Args:
      xs:    (T, num_channels) stream of inputs, oldest first.
      queue: (max_length, num_channels) initial queue state (row 0 = newest).

    Returns:
      popped:    (T, num_channels) popped element for each step.
      new_queue: (max_length, num_channels) final queue state (row 0 = newest).
    """
    T, C = xs.shape
    L, C2 = queue.shape
    assert C == C2, "Number of channels do not match"
    dtype = queue.dtype

    Cp = ((C + _LANE - 1) // _LANE) * _LANE          # lane-dense channel dim
    Tp = ((T + _TB - 1) // _TB) * _TB                # sublane-aligned timesteps
    nb = Tp // _TB

    xs_p = jnp.zeros((Tp, Cp), dtype).at[:T, :C].set(xs.astype(dtype))
    q_p = jnp.zeros((L, 1, Cp), dtype).at[:, 0, :C].set(queue)

    kernel = _make_stream_kernel(T, L, _TB)

    popped_p, q_phys = pl.pallas_call(
        kernel,
        grid=(nb,),
        in_specs=[
            pl.BlockSpec((_TB, Cp), lambda tb: (tb, 0)),       # xs stream
            pl.BlockSpec((L, 1, Cp), lambda tb: (0, 0, 0)),    # initial queue
        ],
        out_specs=(
            pl.BlockSpec((_TB, Cp), lambda tb: (tb, 0)),       # popped stream
            pl.BlockSpec((L, 1, Cp), lambda tb: (0, 0, 0)),    # final queue
        ),
        out_shape=(
            jax.ShapeDtypeStruct((Tp, Cp), dtype),
            jax.ShapeDtypeStruct((L, 1, Cp), dtype),
        ),
        input_output_aliases={1: 1},   # donate queue input buffer to output
        compiler_params=pltpu.CompilerParams(
            dimension_semantics=("arbitrary",)),
    )(xs_p, q_p)

    popped = popped_p[:T, :C]
    # Un-rotate the circular buffer back to canonical order (row 0 = newest).
    # head_final = (-T) mod L  =>  canonical[i] = phys[(i + head_final) mod L]
    # which is a static roll by (T mod L).
    new_queue = jnp.roll(q_phys[:, 0, :C], shift=(T % L), axis=0)
    return popped, new_queue


def convolution_queue_forward(x, queue):
    """Single ConvolutionQueue.forward step (thin wrapper over the stream)."""
    C, = x.shape
    popped, new_queue = convolution_queue_stream(x.reshape(1, C), queue)
    return popped.reshape(C), new_queue


def clear_queue(num_channels, max_length, dtype=jnp.float32):
    """Equivalent of ConvolutionQueue.clear_queue(): all-zero queue state."""
    return jnp.zeros((max_length, num_channels), dtype=dtype)


if __name__ == "__main__":
    import numpy as np
    from collections import deque as _deque

    num_channels = 4
    max_length = 8
    T = max_length + 2  # 10 steps: drains the initial zeros and recirculates

    key = jax.random.PRNGKey(0)
    xs = jax.random.normal(key, (T, num_channels), dtype=jnp.float32)

    # --- Fused Pallas path (one kernel launch for the whole stream) --------
    queue0 = clear_queue(num_channels, max_length)
    popped_all, queue_final = convolution_queue_stream(xs, queue0)
    jax.block_until_ready(popped_all)
    jax.block_until_ready(queue_final)

    # Single-step API (exercises the padded-tail guard path, T=1).
    p1, q1 = convolution_queue_forward(xs[0], queue0)
    jax.block_until_ready(p1)
    jax.block_until_ready(q1)

    # --- Pure-Python deque reference (mirrors the PyTorch module) ----------
    ref_q = _deque(maxlen=max_length)
    for _ in range(max_length):
        ref_q.appendleft(np.zeros((num_channels,), dtype=np.float32))
    xs_np = np.asarray(xs)
    ref_popped = []
    for t in range(T):
        p = ref_q.pop()
        ref_q.appendleft(xs_np[t])
        ref_popped.append(p)
    ref_popped = np.stack(ref_popped)
    ref_queue = np.stack(list(ref_q))

    assert popped_all.shape == (T, num_channels)
    assert queue_final.shape == (max_length, num_channels)
    np.testing.assert_allclose(np.asarray(popped_all), ref_popped, atol=0.0)
    np.testing.assert_allclose(np.asarray(queue_final), ref_queue, atol=0.0)

    # Single-step checks: popping from an all-zero queue returns zeros, and
    # the new queue has x as its newest (row 0) entry.
    np.testing.assert_allclose(np.asarray(p1),
                               np.zeros(num_channels, np.float32), atol=0.0)
    np.testing.assert_allclose(np.asarray(q1[0]), xs_np[0], atol=0.0)
    np.testing.assert_allclose(np.asarray(q1[1:]),
                               np.zeros((max_length - 1, num_channels),
                                        np.float32), atol=0.0)

    print("KERNEL_OK")
</pallas_src>

<mosaic_0001>
module attributes {stable_mosaic.version = 11 : i64} {
  func.func @kernel(%arg0: i32, %arg1: memref<8x128xf32, #tpu.memory_space<vmem>>, %arg2: memref<8x1x128xf32, #tpu.memory_space<vmem>>, %arg3: memref<8x128xf32, #tpu.memory_space<vmem>>, %arg4: memref<8x1x128xf32, #tpu.memory_space<vmem>>) attributes {dimension_semantics = [#tpu.dimension_semantics<arbitrary>], iteration_bounds = array<i64: 2>, scalar_prefetch = 0 : i64, scratch_operands = 0 : i64, tpu.core_type = #tpu.core_type<tc>, window_params = [{transform_indices = @transform_0, window_bounds = array<i64: 8, 128>}, {pipeline_mode = #tpu.pipeline_mode<synchronous>, transform_indices = @transform_1, window_bounds = array<i64: 8, 1, 128>}, {transform_indices = @transform_2, window_bounds = array<i64: 8, 128>}, {pipeline_mode = #tpu.pipeline_mode<synchronous>, transform_indices = @transform_3, window_bounds = array<i64: 8, 1, 128>}]} {
    %c0_i32 = arith.constant 0 : i32
    %0 = arith.cmpi eq, %arg0, %c0_i32 : i32
    %1 = arith.extui %0 : i1 to i32
    %c0_i32_0 = arith.constant 0 : i32
    %2 = arith.cmpi ne, %1, %c0_i32_0 : i32
    scf.if %2 {
      %c0 = arith.constant 0 : index
      %c0_24 = arith.constant 0 : index
      %c0_25 = arith.constant 0 : index
      %43 = vector.load %arg2[%c0, %c0_24, %c0_25] : memref<8x1x128xf32, #tpu.memory_space<vmem>>, vector<8x1x128xf32>
      %c0_26 = arith.constant 0 : index
      %c0_27 = arith.constant 0 : index
      %c0_28 = arith.constant 0 : index
      %44 = vector.load %arg4[%c0_26, %c0_27, %c0_28] : memref<8x1x128xf32, #tpu.memory_space<vmem>>, vector<8x1x128xf32>
      tpu.vector_store %arg4[%c0_26, %c0_27, %c0_28], %43 {strides = array<i32>} : memref<8x1x128xf32, #tpu.memory_space<vmem>>, vector<8x1x128xf32>,
    } else {
    }
    %c8_i32 = arith.constant 8 : i32
    %3 = arith.muli %arg0, %c8_i32 : i32
    %c0_i32_1 = arith.constant 0 : i32
    %4 = arith.addi %3, %c0_i32_1 : i32
    %c10_i32 = arith.constant 10 : i32
    %5 = arith.cmpi slt, %4, %c10_i32 : i32
    %6 = arith.extui %5 : i1 to i32
    %c0_i32_2 = arith.constant 0 : i32
    %7 = arith.cmpi ne, %6, %c0_i32_2 : i32
    scf.if %7 {
      %c8_i32_24 = arith.constant 8 : i32
      %c0_i32_25 = arith.constant 0 : i32
      %43 = arith.cmpi eq, %c8_i32_24, %c0_i32_25 : i32
      %c1_i32_26 = arith.constant 1 : i32
      %44 = arith.select %43, %c1_i32_26, %c8_i32_24 : i32
      %45 = arith.remsi %4, %44 : i32
      %c0_i32_27 = arith.constant 0 : i32
      %46 = arith.cmpi ne, %45, %c0_i32_27 : i32
      %c0_i32_28 = arith.constant 0 : i32
      %47 = arith.cmpi slt, %45, %c0_i32_28 : i32
      %c0_i32_29 = arith.constant 0 : i32
      %48 = arith.cmpi slt, %44, %c0_i32_29 : i32
      %49 = arith.xori %47, %48 : i1
      %50 = arith.andi %49, %46 : i1
      %51 = arith.addi %45, %44 : i32
      %52 = arith.select %50, %51, %45 : i32
      %c7_i32_30 = arith.constant 7 : i32
      %53 = arith.subi %c7_i32_30, %52 : i32
      %54 = arith.index_cast %53 : i32 to index
      %c0 = arith.constant 0 : index
      %c0_31 = arith.constant 0 : index
      %55 = vector.load %arg4[%54, %c0, %c0_31] : memref<8x1x128xf32, #tpu.memory_space<vmem>>, vector<1x1x128xf32>
      %56 = vector.shape_cast %55 : vector<1x1x128xf32> to vector<1x128xf32>
      %c0_32 = arith.constant 0 : index
      %c0_33 = arith.constant 0 : index
      %57 = vector.load %arg3[%c0_32, %c0_33] : memref<8x128xf32, #tpu.memory_space<vmem>>, vector<1x128xf32>
      tpu.vector_store %arg3[%c0_32, %c0_33], %56 {strides = array<i32>} : memref<8x128xf32, #tpu.memory_space<vmem>>, vector<1x128xf32>,
      %c0_34 = arith.constant 0 : index
      %c0_35 = arith.constant 0 : index
      %58 = vector.load %arg1[%c0_34, %c0_35] : memref<8x128xf32, #tpu.memory_space<vmem>>, vector<1x128xf32>
      %59 = arith.index_cast %53 : i32 to index
      %c0_36 = arith.constant 0 : index
      %c0_37 = arith.constant 0 : index
      %60 = vector.load %arg4[%59, %c0_36, %c0_37] : memref<8x1x128xf32, #tpu.memory_space<vmem>>, vector<1x1x128xf32>
      %61 = vector.shape_cast %60 : vector<1x1x128xf32> to vector<1x128xf32>
      %62 = vector.shape_cast %58 : vector<1x128xf32> to vector<1x1x128xf32>
      tpu.vector_store %arg4[%59, %c0_36, %c0_37], %62 {strides = array<i32>} : memref<8x1x128xf32, #tpu.memory_space<vmem>>, vector<1x1x128xf32>,
    } else {
    }
    %c8_i32_3 = arith.constant 8 : i32
    %8 = arith.muli %arg0, %c8_i32_3 : i32
    %c1_i32 = arith.constant 1 : i32
    %9 = arith.addi %8, %c1_i32 : i32
    %c10_i32_4 = arith.constant 10 : i32
    %10 = arith.cmpi slt, %9, %c10_i32_4 : i32
    %11 = arith.extui %10 : i1 to i32
    %c0_i32_5 = arith.constant 0 : i32
    %12 = arith.cmpi ne, %11, %c0_i32_5 : i32
    scf.if %12 {
      %c8_i32_24 = arith.constant 8 : i32
      %c0_i32_25 = arith.constant 0 : i32
      %43 = arith.cmpi eq, %c8_i32_24, %c0_i32_25 : i32
      %c1_i32_26 = arith.constant 1 : i32
      %44 = arith.select %43, %c1_i32_26, %c8_i32_24 : i32
      %45 = arith.remsi %9, %44 : i32
      %c0_i32_27 = arith.constant 0 : i32
      %46 = arith.cmpi ne, %45, %c0_i32_27 : i32
      %c0_i32_28 = arith.constant 0 : i32
      %47 = arith.cmpi slt, %45, %c0_i32_28 : i32
      %c0_i32_29 = arith.constant 0 : i32
      %48 = arith.cmpi slt, %44, %c0_i32_29 : i32
      %49 = arith.xori %47, %48 : i1
      %50 = arith.andi %49, %46 : i1
      %51 = arith.addi %45, %44 : i32
      %52 = arith.select %50, %51, %45 : i32
      %c7_i32_30 = arith.constant 7 : i32
      %53 = arith.subi %c7_i32_30, %52 : i32
      %54 = arith.index_cast %53 : i32 to index
      %c0 = arith.constant 0 : index
      %c0_31 = arith.constant 0 : index
      %55 = vector.load %arg4[%54, %c0, %c0_31] : memref<8x1x128xf32, #tpu.memory_space<vmem>>, vector<1x1x128xf32>
      %56 = vector.shape_cast %55 : vector<1x1x128xf32> to vector<1x128xf32>
      %c1 = arith.constant 1 : index
      %c0_32 = arith.constant 0 : index
      %57 = vector.load %arg3[%c1, %c0_32] : memref<8x128xf32, #tpu.memory_space<vmem>>, vector<1x128xf32>
      tpu.vector_store %arg3[%c1, %c0_32], %56 {strides = array<i32>} : memref<8x128xf32, #tpu.memory_space<vmem>>, vector<1x128xf32>,
      %c1_33 = arith.constant 1 : index
      %c0_34 = arith.constant 0 : index
      %58 = vector.load %arg1[%c1_33, %c0_34] : memref<8x128xf32, #tpu.memory_space<vmem>>, vector<1x128xf32>
      %59 = arith.index_cast %53 : i32 to index
      %c0_35 = arith.constant 0 : index
      %c0_36 = arith.constant 0 : index
      %60 = vector.load %arg4[%59, %c0_35, %c0_36] : memref<8x1x128xf32, #tpu.memory_space<vmem>>, vector<1x1x128xf32>
      %61 = vector.shape_cast %60 : vector<1x1x128xf32> to vector<1x128xf32>
      %62 = vector.shape_cast %58 : vector<1x128xf32> to vector<1x1x128xf32>
      tpu.vector_store %arg4[%59, %c0_35, %c0_36], %62 {strides = array<i32>} : memref<8x1x128xf32, #tpu.memory_space<vmem>>, vector<1x1x128xf32>,
    } else {
    }
    %c8_i32_6 = arith.constant 8 : i32
    %13 = arith.muli %arg0, %c8_i32_6 : i32
    %c2_i32 = arith.constant 2 : i32
    %14 = arith.addi %13, %c2_i32 : i32
    %c10_i32_7 = arith.constant 10 : i32
    %15 = arith.cmpi slt, %14, %c10_i32_7 : i32
    %16 = arith.extui %15 : i1 to i32
    %c0_i32_8 = arith.constant 0 : i32
    %17 = arith.cmpi ne, %16, %c0_i32_8 : i32
    scf.if %17 {
      %c8_i32_24 = arith.constant 8 : i32
      %c0_i32_25 = arith.constant 0 : i32
      %43 = arith.cmpi eq, %c8_i32_24, %c0_i32_25 : i32
      %c1_i32_26 = arith.constant 1 : i32
      %44 = arith.select %43, %c1_i32_26, %c8_i32_24 : i32
      %45 = arith.remsi %14, %44 : i32
      %c0_i32_27 = arith.constant 0 : i32
      %46 = arith.cmpi ne, %45, %c0_i32_27 : i32
      %c0_i32_28 = arith.constant 0 : i32
      %47 = arith.cmpi slt, %45, %c0_i32_28 : i32
      %c0_i32_29 = arith.constant 0 : i32
      %48 = arith.cmpi slt, %44, %c0_i32_29 : i32
      %49 = arith.xori %47, %48 : i1
      %50 = arith.andi %49, %46 : i1
      %51 = arith.addi %45, %44 : i32
      %52 = arith.select %50, %51, %45 : i32
      %c7_i32_30 = arith.constant 7 : i32
      %53 = arith.subi %c7_i32_30, %52 : i32
      %54 = arith.index_cast %53 : i32 to index
      %c0 = arith.constant 0 : index
      %c0_31 = arith.constant 0 : index
      %55 = vector.load %arg4[%54, %c0, %c0_31] : memref<8x1x128xf32, #tpu.memory_space<vmem>>, vector<1x1x128xf32>
      %56 = vector.shape_cast %55 : vector<1x1x128xf32> to vector<1x128xf32>
      %c2 = arith.constant 2 : index
      %c0_32 = arith.constant 0 : index
      %57 = vector.load %arg3[%c2, %c0_32] : memref<8x128xf32, #tpu.memory_space<vmem>>, vector<1x128xf32>
      tpu.vector_store %arg3[%c2, %c0_32], %56 {strides = array<i32>} : memref<8x128xf32, #tpu.memory_space<vmem>>, vector<1x128xf32>,
      %c2_33 = arith.constant 2 : index
      %c0_34 = arith.constant 0 : index
      %58 = vector.load %arg1[%c2_33, %c0_34] : memref<8x128xf32, #tpu.memory_space<vmem>>, vector<1x128xf32>
      %59 = arith.index_cast %53 : i32 to index
      %c0_35 = arith.constant 0 : index
      %c0_36 = arith.constant 0 : index
      %60 = vector.load %arg4[%59, %c0_35, %c0_36] : memref<8x1x128xf32, #tpu.memory_space<vmem>>, vector<1x1x128xf32>
      %61 = vector.shape_cast %60 : vector<1x1x128xf32> to vector<1x128xf32>
      %62 = vector.shape_cast %58 : vector<1x128xf32> to vector<1x1x128xf32>
      tpu.vector_store %arg4[%59, %c0_35, %c0_36], %62 {strides = array<i32>} : memref<8x1x128xf32, #tpu.memory_space<vmem>>, vector<1x1x128xf32>,
    } else {
    }
    %c8_i32_9 = arith.constant 8 : i32
    %18 = arith.muli %arg0, %c8_i32_9 : i32
    %c3_i32 = arith.constant 3 : i32
    %19 = arith.addi %18, %c3_i32 : i32
    %c10_i32_10 = arith.constant 10 : i32
    %20 = arith.cmpi slt, %19, %c10_i32_10 : i32
    %21 = arith.extui %20 : i1 to i32
    %c0_i32_11 = arith.constant 0 : i32
    %22 = arith.cmpi ne, %21, %c0_i32_11 : i32
    scf.if %22 {
      %c8_i32_24 = arith.constant 8 : i32
      %c0_i32_25 = arith.constant 0 : i32
      %43 = arith.cmpi eq, %c8_i32_24, %c0_i32_25 : i32
      %c1_i32_26 = arith.constant 1 : i32
      %44 = arith.select %43, %c1_i32_26, %c8_i32_24 : i32
      %45 = arith.remsi %19, %44 : i32
      %c0_i32_27 = arith.constant 0 : i32
      %46 = arith.cmpi ne, %45, %c0_i32_27 : i32
      %c0_i32_28 = arith.constant 0 : i32
      %47 = arith.cmpi slt, %45, %c0_i32_28 : i32
      %c0_i32_29 = arith.constant 0 : i32
      %48 = arith.cmpi slt, %44, %c0_i32_29 : i32
      %49 = arith.xori %47, %48 : i1
      %50 = arith.andi %49, %46 : i1
      %51 = arith.addi %45, %44 : i32
      %52 = arith.select %50, %51, %45 : i32
      %c7_i32_30 = arith.constant 7 : i32
      %53 = arith.subi %c7_i32_30, %52 : i32
      %54 = arith.index_cast %53 : i32 to index
      %c0 = arith.constant 0 : index
      %c0_31 = arith.constant 0 : index
      %55 = vector.load %arg4[%54, %c0, %c0_31] : memref<8x1x128xf32, #tpu.memory_space<vmem>>, vector<1x1x128xf32>
      %56 = vector.shape_cast %55 : vector<1x1x128xf32> to vector<1x128xf32>
      %c3 = arith.constant 3 : index
      %c0_32 = arith.constant 0 : index
      %57 = vector.load %arg3[%c3, %c0_32] : memref<8x128xf32, #tpu.memory_space<vmem>>, vector<1x128xf32>
      tpu.vector_store %arg3[%c3, %c0_32], %56 {strides = array<i32>} : memref<8x128xf32, #tpu.memory_space<vmem>>, vector<1x128xf32>,
      %c3_33 = arith.constant 3 : index
      %c0_34 = arith.constant 0 : index
      %58 = vector.load %arg1[%c3_33, %c0_34] : memref<8x128xf32, #tpu.memory_space<vmem>>, vector<1x128xf32>
      %59 = arith.index_cast %53 : i32 to index
      %c0_35 = arith.constant 0 : index
      %c0_36 = arith.constant 0 : index
      %60 = vector.load %arg4[%59, %c0_35, %c0_36] : memref<8x1x128xf32, #tpu.memory_space<vmem>>, vector<1x1x128xf32>
      %61 = vector.shape_cast %60 : vector<1x1x128xf32> to vector<1x128xf32>
      %62 = vector.shape_cast %58 : vector<1x128xf32> to vector<1x1x128xf32>
      tpu.vector_store %arg4[%59, %c0_35, %c0_36], %62 {strides = array<i32>} : memref<8x1x128xf32, #tpu.memory_space<vmem>>, vector<1x1x128xf32>,
    } else {
    }
    %c8_i32_12 = arith.constant 8 : i32
    %23 = arith.muli %arg0, %c8_i32_12 : i32
    %c4_i32 = arith.constant 4 : i32
    %24 = arith.addi %23, %c4_i32 : i32
    %c10_i32_13 = arith.constant 10 : i32
    %25 = arith.cmpi slt, %24, %c10_i32_13 : i32
    %26 = arith.extui %25 : i1 to i32
    %c0_i32_14 = arith.constant 0 : i32
    %27 = arith.cmpi ne, %26, %c0_i32_14 : i32
    scf.if %27 {
      %c8_i32_24 = arith.constant 8 : i32
      %c0_i32_25 = arith.constant 0 : i32
      %43 = arith.cmpi eq, %c8_i32_24, %c0_i32_25 : i32
      %c1_i32_26 = arith.constant 1 : i32
      %44 = arith.select %43, %c1_i32_26, %c8_i32_24 : i32
      %45 = arith.remsi %24, %44 : i32
      %c0_i32_27 = arith.constant 0 : i32
      %46 = arith.cmpi ne, %45, %c0_i32_27 : i32
      %c0_i32_28 = arith.constant 0 : i32
      %47 = arith.cmpi slt, %45, %c0_i32_28 : i32
      %c0_i32_29 = arith.constant 0 : i32
      %48 = arith.cmpi slt, %44, %c0_i32_29 : i32
      %49 = arith.xori %47, %48 : i1
      %50 = arith.andi %49, %46 : i1
      %51 = arith.addi %45, %44 : i32
      %52 = arith.select %50, %51, %45 : i32
      %c7_i32_30 = arith.constant 7 : i32
      %53 = arith.subi %c7_i32_30, %52 : i32
      %54 = arith.index_cast %53 : i32 to index
      %c0 = arith.constant 0 : index
      %c0_31 = arith.constant 0 : index
      %55 = vector.load %arg4[%54, %c0, %c0_31] : memref<8x1x128xf32, #tpu.memory_space<vmem>>, vector<1x1x128xf32>
      %56 = vector.shape_cast %55 : vector<1x1x128xf32> to vector<1x128xf32>
      %c4 = arith.constant 4 : index
      %c0_32 = arith.constant 0 : index
      %57 = vector.load %arg3[%c4, %c0_32] : memref<8x128xf32, #tpu.memory_space<vmem>>, vector<1x128xf32>
      tpu.vector_store %arg3[%c4, %c0_32], %56 {strides = array<i32>} : memref<8x128xf32, #tpu.memory_space<vmem>>, vector<1x128xf32>,
      %c4_33 = arith.constant 4 : index
      %c0_34 = arith.constant 0 : index
      %58 = vector.load %arg1[%c4_33, %c0_34] : memref<8x128xf32, #tpu.memory_space<vmem>>, vector<1x128xf32>
      %59 = arith.index_cast %53 : i32 to index
      %c0_35 = arith.constant 0 : index
      %c0_36 = arith.constant 0 : index
      %60 = vector.load %arg4[%59, %c0_35, %c0_36] : memref<8x1x128xf32, #tpu.memory_space<vmem>>, vector<1x1x128xf32>
      %61 = vector.shape_cast %60 : vector<1x1x128xf32> to vector<1x128xf32>
      %62 = vector.shape_cast %58 : vector<1x128xf32> to vector<1x1x128xf32>
      tpu.vector_store %arg4[%59, %c0_35, %c0_36], %62 {strides = array<i32>} : memref<8x1x128xf32, #tpu.memory_space<vmem>>, vector<1x1x128xf32>,
    } else {
    }
    %c8_i32_15 = arith.constant 8 : i32
    %28 = arith.muli %arg0, %c8_i32_15 : i32
    %c5_i32 = arith.constant 5 : i32
    %29 = arith.addi %28, %c5_i32 : i32
    %c10_i32_16 = arith.constant 10 : i32
    %30 = arith.cmpi slt, %29, %c10_i32_16 : i32
    %31 = arith.extui %30 : i1 to i32
    %c0_i32_17 = arith.constant 0 : i32
    %32 = arith.cmpi ne, %31, %c0_i32_17 : i32
    scf.if %32 {
      %c8_i32_24 = arith.constant 8 : i32
      %c0_i32_25 = arith.constant 0 : i32
      %43 = arith.cmpi eq, %c8_i32_24, %c0_i32_25 : i32
      %c1_i32_26 = arith.constant 1 : i32
      %44 = arith.select %43, %c1_i32_26, %c8_i32_24 : i32
      %45 = arith.remsi %29, %44 : i32
      %c0_i32_27 = arith.constant 0 : i32
      %46 = arith.cmpi ne, %45, %c0_i32_27 : i32
      %c0_i32_28 = arith.constant 0 : i32
      %47 = arith.cmpi slt, %45, %c0_i32_28 : i32
      %c0_i32_29 = arith.constant 0 : i32
      %48 = arith.cmpi slt, %44, %c0_i32_29 : i32
      %49 = arith.xori %47, %48 : i1
      %50 = arith.andi %49, %46 : i1
      %51 = arith.addi %45, %44 : i32
      %52 = arith.select %50, %51, %45 : i32
      %c7_i32_30 = arith.constant 7 : i32
      %53 = arith.subi %c7_i32_30, %52 : i32
      %54 = arith.index_cast %53 : i32 to index
      %c0 = arith.constant 0 : index
      %c0_31 = arith.constant 0 : index
      %55 = vector.load %arg4[%54, %c0, %c0_31] : memref<8x1x128xf32, #tpu.memory_space<vmem>>, vector<1x1x128xf32>
      %56 = vector.shape_cast %55 : vector<1x1x128xf32> to vector<1x128xf32>
      %c5 = arith.constant 5 : index
      %c0_32 = arith.constant 0 : index
      %57 = vector.load %arg3[%c5, %c0_32] : memref<8x128xf32, #tpu.memory_space<vmem>>, vector<1x128xf32>
      tpu.vector_store %arg3[%c5, %c0_32], %56 {strides = array<i32>} : memref<8x128xf32, #tpu.memory_space<vmem>>, vector<1x128xf32>,
      %c5_33 = arith.constant 5 : index
      %c0_34 = arith.constant 0 : index
      %58 = vector.load %arg1[%c5_33, %c0_34] : memref<8x128xf32, #tpu.memory_space<vmem>>, vector<1x128xf32>
      %59 = arith.index_cast %53 : i32 to index
      %c0_35 = arith.constant 0 : index
      %c0_36 = arith.constant 0 : index
      %60 = vector.load %arg4[%59, %c0_35, %c0_36] : memref<8x1x128xf32, #tpu.memory_space<vmem>>, vector<1x1x128xf32>
      %61 = vector.shape_cast %60 : vector<1x1x128xf32> to vector<1x128xf32>
      %62 = vector.shape_cast %58 : vector<1x128xf32> to vector<1x1x128xf32>
      tpu.vector_store %arg4[%59, %c0_35, %c0_36], %62 {strides = array<i32>} : memref<8x1x128xf32, #tpu.memory_space<vmem>>, vector<1x1x128xf32>,
    } else {
    }
    %c8_i32_18 = arith.constant 8 : i32
    %33 = arith.muli %arg0, %c8_i32_18 : i32
    %c6_i32 = arith.constant 6 : i32
    %34 = arith.addi %33, %c6_i32 : i32
    %c10_i32_19 = arith.constant 10 : i32
    %35 = arith.cmpi slt, %34, %c10_i32_19 : i32
    %36 = arith.extui %35 : i1 to i32
    %c0_i32_20 = arith.constant 0 : i32
    %37 = arith.cmpi ne, %36, %c0_i32_20 : i32
    scf.if %37 {
      %c8_i32_24 = arith.constant 8 : i32
      %c0_i32_25 = arith.constant 0 : i32
      %43 = arith.cmpi eq, %c8_i32_24, %c0_i32_25 : i32
      %c1_i32_26 = arith.constant 1 : i32
      %44 = arith.select %43, %c1_i32_26, %c8_i32_24 : i32
      %45 = arith.remsi %34, %44 : i32
      %c0_i32_27 = arith.constant 0 : i32
      %46 = arith.cmpi ne, %45, %c0_i32_27 : i32
      %c0_i32_28 = arith.constant 0 : i32
      %47 = arith.cmpi slt, %45, %c0_i32_28 : i32
      %c0_i32_29 = arith.constant 0 : i32
      %48 = arith.cmpi slt, %44, %c0_i32_29 : i32
      %49 = arith.xori %47, %48 : i1
      %50 = arith.andi %49, %46 : i1
      %51 = arith.addi %45, %44 : i32
      %52 = arith.select %50, %51, %45 : i32
      %c7_i32_30 = arith.constant 7 : i32
      %53 = arith.subi %c7_i32_30, %52 : i32
      %54 = arith.index_cast %53 : i32 to index
      %c0 = arith.constant 0 : index
      %c0_31 = arith.constant 0 : index
      %55 = vector.load %arg4[%54, %c0, %c0_31] : memref<8x1x128xf32, #tpu.memory_space<vmem>>, vector<1x1x128xf32>
      %56 = vector.shape_cast %55 : vector<1x1x128xf32> to vector<1x128xf32>
      %c6 = arith.constant 6 : index
      %c0_32 = arith.constant 0 : index
      %57 = vector.load %arg3[%c6, %c0_32] : memref<8x128xf32, #tpu.memory_space<vmem>>, vector<1x128xf32>
      tpu.vector_store %arg3[%c6, %c0_32], %56 {strides = array<i32>} : memref<8x128xf32, #tpu.memory_space<vmem>>, vector<1x128xf32>,
      %c6_33 = arith.constant 6 : index
      %c0_34 = arith.constant 0 : index
      %58 = vector.load %arg1[%c6_33, %c0_34] : memref<8x128xf32, #tpu.memory_space<vmem>>, vector<1x128xf32>
      %59 = arith.index_cast %53 : i32 to index
      %c0_35 = arith.constant 0 : index
      %c0_36 = arith.constant 0 : index
      %60 = vector.load %arg4[%59, %c0_35, %c0_36] : memref<8x1x128xf32, #tpu.memory_space<vmem>>, vector<1x1x128xf32>
      %61 = vector.shape_cast %60 : vector<1x1x128xf32> to vector<1x128xf32>
      %62 = vector.shape_cast %58 : vector<1x128xf32> to vector<1x1x128xf32>
      tpu.vector_store %arg4[%59, %c0_35, %c0_36], %62 {strides = array<i32>} : memref<8x1x128xf32, #tpu.memory_space<vmem>>, vector<1x1x128xf32>,
    } else {
    }
    %c8_i32_21 = arith.constant 8 : i32
    %38 = arith.muli %arg0, %c8_i32_21 : i32
    %c7_i32 = arith.constant 7 : i32
    %39 = arith.addi %38, %c7_i32 : i32
    %c10_i32_22 = arith.constant 10 : i32
    %40 = arith.cmpi slt, %39, %c10_i32_22 : i32
    %41 = arith.extui %40 : i1 to i32
    %c0_i32_23 = arith.constant 0 : i32
    %42 = arith.cmpi ne, %41, %c0_i32_23 : i32
    scf.if %42 {
      %c8_i32_24 = arith.constant 8 : i32
      %c0_i32_25 = arith.constant 0 : i32
      %43 = arith.cmpi eq, %c8_i32_24, %c0_i32_25 : i32
      %c1_i32_26 = arith.constant 1 : i32
      %44 = arith.select %43, %c1_i32_26, %c8_i32_24 : i32
      %45 = arith.remsi %39, %44 : i32
      %c0_i32_27 = arith.constant 0 : i32
      %46 = arith.cmpi ne, %45, %c0_i32_27 : i32
      %c0_i32_28 = arith.constant 0 : i32
      %47 = arith.cmpi slt, %45, %c0_i32_28 : i32
      %c0_i32_29 = arith.constant 0 : i32
      %48 = arith.cmpi slt, %44, %c0_i32_29 : i32
      %49 = arith.xori %47, %48 : i1
      %50 = arith.andi %49, %46 : i1
      %51 = arith.addi %45, %44 : i32
      %52 = arith.select %50, %51, %45 : i32
      %c7_i32_30 = arith.constant 7 : i32
      %53 = arith.subi %c7_i32_30, %52 : i32
      %54 = arith.index_cast %53 : i32 to index
      %c0 = arith.constant 0 : index
      %c0_31 = arith.constant 0 : index
      %55 = vector.load %arg4[%54, %c0, %c0_31] : memref<8x1x128xf32, #tpu.memory_space<vmem>>, vector<1x1x128xf32>
      %56 = vector.shape_cast %55 : vector<1x1x128xf32> to vector<1x128xf32>
      %c7 = arith.constant 7 : index
      %c0_32 = arith.constant 0 : index
      %57 = vector.load %arg3[%c7, %c0_32] : memref<8x128xf32, #tpu.memory_space<vmem>>, vector<1x128xf32>
      tpu.vector_store %arg3[%c7, %c0_32], %56 {strides = array<i32>} : memref<8x128xf32, #tpu.memory_space<vmem>>, vector<1x128xf32>,
      %c7_33 = arith.constant 7 : index
      %c0_34 = arith.constant 0 : index
      %58 = vector.load %arg1[%c7_33, %c0_34] : memref<8x128xf32, #tpu.memory_space<vmem>>, vector<1x128xf32>
      %59 = arith.index_cast %53 : i32 to index
      %c0_35 = arith.constant 0 : index
      %c0_36 = arith.constant 0 : index
      %60 = vector.load %arg4[%59, %c0_35, %c0_36] : memref<8x1x128xf32, #tpu.memory_space<vmem>>, vector<1x1x128xf32>
      %61 = vector.shape_cast %60 : vector<1x1x128xf32> to vector<1x128xf32>
      %62 = vector.shape_cast %58 : vector<1x128xf32> to vector<1x1x128xf32>
      tpu.vector_store %arg4[%59, %c0_35, %c0_36], %62 {strides = array<i32>} : memref<8x1x128xf32, #tpu.memory_space<vmem>>, vector<1x1x128xf32>,
    } else {
    }
    return
  }
  func.func @transform_0(%arg0: i32) -> (i32, i32) {
    %c0_i32 = arith.constant 0 : i32
    %c0_i32_0 = arith.constant 0 : i32
    return %arg0, %c0_i32 : i32, i32
  }
  func.func @transform_1(%arg0: i32) -> (i32, i32, i32) {
    %c0_i32 = arith.constant 0 : i32
    %c0_i32_0 = arith.constant 0 : i32
    %c0_i32_1 = arith.constant 0 : i32
    %c0_i32_2 = arith.constant 0 : i32
    return %c0_i32, %c0_i32_0, %c0_i32_1 : i32, i32, i32
  }
  func.func @transform_2(%arg0: i32) -> (i32, i32) {
    %c0_i32 = arith.constant 0 : i32
    %c0_i32_0 = arith.constant 0 : i32
    return %arg0, %c0_i32 : i32, i32
  }
  func.func @transform_3(%arg0: i32) -> (i32, i32, i32) {
    %c0_i32 = arith.constant 0 : i32
    %c0_i32_0 = arith.constant 0 : i32
    %c0_i32_1 = arith.constant 0 : i32
    %c0_i32_2 = arith.constant 0 : i32
    return %c0_i32, %c0_i32_0, %c0_i32_1 : i32, i32, i32
  }
}

</mosaic_0001>

<bundles_post_ra>
// kernel: tpu_custom_call.1
= control target key start
LH: loop header
LB: loop body
LE: loop exit
PB: predicated region body
PF: predicated region fallthrough
CT: control target
= control target key end

     0   :  { %9 = vsyncpa [#allocation3], 0  ;;  %s958_s0 = inlined_call_operand.vmem [shape: f32[16,128], index: 0, kind: input, shape index: {}]   ;;  %s959_s1 = inlined_call_operand.hbm [shape: f32[8,1,128], index: 1, kind: input, shape index: {}, may-alias: {1,3}]   ;;  %s960_s2 = inlined_call_operand.hbm [shape: f32[16,128], index: 2, kind: output, shape index: {0}]   ;;  %s961_s3 = inlined_call_operand.hbm [shape: f32[8,1,128], index: 3, kind: output, shape index: {1}, may-alias: {1,3}]  }
   0x1   :  { %10 = vsyncpa [#allocation4], 0 }
   0x2   :  { %12 = vsyncpa [#allocation4 + $0x1], 0 }
   0x3   :  { %13 = vsyncpa [#allocation7], 0  ;;  %s763_s12 = smov 0   ;;  %s765_s13 = smov 0  }
   0x4   :  { %s767_s14 = smov 0   ;;  %s769_s15 = smov 0  }
   0x5 LB: > { %s784_s16 = sadd.s32 4294967295, %s734_s15   ;;  %s501_s17 = sadd.s32 4294967294, %s734_s15   ;;  %s734_s15 = sphi %s769_s15, %s984_s15   ;;  %s730_s14 = sphi %s767_s14, %s983_s14   ;;  %s726_s13 = sphi %s765_s13, %s982_s13   ;;  %s722_s12 = sphi %s763_s12, %s981_s12  }
   0x6   : > { %s788_s18 = sadd.s32 1, %s734_s15   ;;  %s73_s19 = sadd.s32 1, %s730_s14 }
   0x7   : > { %s70_s20 = ssub.s32 %s734_s15, %s788_s18  ;;  %p83_p0 = scmp.ne.s32.totalorder %s730_s14, %s726_s13 }
   0x8   : > { %p71_p1 = scmp.eq.s32.totalorder %s70_s20, 0  ;;  %p962_p2 = scmp.eq.s32.totalorder %s784_s16, 1 }
   0x9   : > { %p89_p3 = scmp.ne.s32.totalorder %s726_s13, %s722_s12  ;;  %p90_p4 = scmp.eq.s32.totalorder %s501_s17, 1 }
   0xa   : > { %s799_s21 = scalar_select %p71_p1, %s730_s14, %s73_s19  }
   0xb   : > { %p803_p5 = por %p962_p2, %p83_p0  ;;  %p807_p6 = por %p90_p4, %p89_p3 }
   0xc   : > { %p502_p7 = scmp.ge.s32.totalorder %s734_s15, 1  ;;  %p118_p8 = scmp.lt.s32.totalorder %s734_s15, 3 }
   0xd   : > { %s966_s22 = scalar_select %p803_p5, 1, 0 }
   0xe   : > { %s967_s23 = scalar_select %p807_p6, 1, 0 }
   0xf   : > { %p963_p10 = scmp.eq.s32.totalorder %s784_s16, 0  ;;  %p815_p11 = pnand %p502_p7, %p118_p8 }
  0x10   : > { %s736_s25 = smov [#allocation2]   ;;  %s610_s30 = scalar_lea.hbm %s959_s1, 128 }
  0x11   : > { %s968_s24 = scalar_select %p815_p11, 1, 0 }
  0x12   : > { %s130_s26 = sshll.u32 %s736_s25, 4  ;;  %p559_p12 = pneg %p815_p11  ;;  %s131_s26 = int_to_ptr.vmem [resolvable:$true] %s130_s26 }
  0x13   : > { %p611_p0 = scmp.ne.s32.totalorder %s959_s1, %s610_s30  ;;  %p617_p7 = scmp.lt.u32.totalorder %s610_s30, %s959_s1 }
  0x14   : > { %p823_p13 = pnand %p963_p10, %p559_p12 }
  0x16   : > { %p612_p1 = pneg %p823_p13 }
  0x18   : > { %p613_p3 = pnand %p612_p1, %p611_p0 }
  0x1a   : > { %p614_p4 = pneg %p613_p3 }
  0x1c   : > { %p619_p8 = pnand %p617_p7, %p614_p4 }
  0x1e   : > { %622 = shalt.err (!%p619_p8)
}
  0x1f   : > { %s623_s8 = scalar_lea.vmem %s131_s26, 128  ;;  %p631_p10 = scmp.lt.s32.totalorder %s131_s26, %s131_s26 }
  0x20   : > { %p624_p12 = scmp.ne.s32.totalorder %s131_s26, %s623_s8  ;;  %p632_p6 = scmp.lt.s32.totalorder %s623_s8, %s623_s8 }
  0x22   : > { %p626_p2 = pnand %p624_p12, %p612_p1  ;;  %p633_p5 = por %p632_p6, %p631_p10 }
  0x24   : > { %p627_p9 = pneg %p626_p2 }
  0x26   : > { %p634_p11 = pnand %p633_p5, %p627_p9 }
  0x28   : > { %637 = shalt.err (!%p634_p11)
}
  0x29   : > { %s737_s9 = smov 16   ;;  %s738_s10 = smov 1  }
  0x2a   : > { %562 = dma.hbm_to_vmem [thread:$0]  (!%p823_p13), %s959_s1, 128, %s131_s26, [#allocation3], %s737_s9, %s737_s9, %s738_s10  }
  0x2b   : > { %p970_p0 = scmp.ne.s32.totalorder %s968_s24, 0 }
  0x2c   : > { %p971_p3 = scmp.eq.s32.totalorder (!%p970_p0), %s784_s16, 0 }
  0x2d   : > { %153 = sbr.rel (%p970_p0) target bundleno = 261 (0x105), region = 28 }
  0x34   : > { %709 = dma.done.wait (%p971_p3), [#allocation3], 128   ;;  %p972_p2 = pmov %p971_p3 }
  0x35   : > { %s171_s19 = sand.u32 1, %s726_s13   ;;  %p176_p5 = scmp.lt.s32.totalorder %s784_s16, 1 }
  0x36   : > { %711 = vsyncadd (%p972_p2), [#allocation3], 4294967168  ;;  %s507_s20 = sshll.u32 %s171_s19, 3  ;;  %p973_p6 = scmp.ne.s32.totalorder %s784_s16, 0 }
  0x37   : > { %s177_s25 = scalar_select %p176_p5, %s784_s16, 1 }
  0x38   : > { %s859_s29 = scalar_lea.vmem [#allocation5], %s507_s20  ;;  %183 = sbr.rel (%p973_p6) target bundleno = 63 (0x3f), region = 36  ;;  %v184_v0 = vld [vmem:[#allocation2] sm:$0xff] (!%p973_p6)  }
  0x39   : > { %s508_s27 = sshll.u32 %s177_s25, 3  ;;  %192 = vst [vmem:[#allocation6] sm:$0xff] (!%p973_p6), %v184_v0  }
  0x3a   : > { %s857_s24 = scalar_lea.vmem %s958_s0, %s508_s27 }
  0x3f PF: > { %s864_s30 = sshll.u32 %s784_s16, 3 }
  0x40   : > { %p511_p9 = scmp.ge.s32.totalorder %s864_s30, 10 }
  0x41   : > { %p205_p10 = scmp.lt.s32.totalorder (!%p511_p9), %s864_s30, 0  ;;  %s206_s4 = ssub.s32 (!%p511_p9), 0, %s864_s30  ;;  %v221_v1 = vld [vmem:[%s857_s24] sm:$0x1] (!%p511_p9) }
  0x42   : > { %204 = sbr.rel (%p511_p9) target bundleno = 81 (0x51), region = 40  ;;  %s512_s5 = smin.u32 (!%p511_p9), %s864_s30, %s206_s4 }
  0x43   : > { %s208_s6 = sand.u32 (!%p511_p9), 7, %s512_s5  }
  0x44   : > { %s209_s7 = ssub.s32 (!%p511_p9), 0, %s208_s6 }
  0x49   : > { %s986_s7 = smov (!%p205_p10, %s209_s7), %s208_s6 }
  0x4a   : > { %p514_p11 = scmp.lt.s32.totalorder %s986_s7, 0  ;;  %s215_s8 = sadd.s32 8, %s986_s7 }
  0x4c   : > { %s988_s8 = smov (!%p514_p11, %s215_s8), %s986_s7 }
  0x4d   : > { %s217_s9 = ssub.s32 7, %s988_s8 }
  0x4e   : > { %s218_s10 = scalar_lea.vmem [#allocation6], %s217_s9 }
  0x4f   : > { %v219_v2 = vld [vmem:[%s218_s10] sm:$0x1] }
  0x50   : > { %220 = vst [vmem:[%s859_s29] sm:$0x1] %v219_v2  ;;  %222 = vst [vmem:[%s218_s10] sm:$0x1] %v221_v1 }
  0x51 PF: > { %s223_s11 = sadd.s32 1, %s864_s30 }
  0x52   : > { %p515_p13 = scmp.ge.s32.totalorder %s223_s11, 10 }
  0x53   : > { %p228_p1 = scmp.lt.s32.totalorder (!%p515_p13), %s223_s11, 0  ;;  %s229_s17 = ssub.s32 (!%p515_p13), 0, %s223_s11  ;;  %v244_v3 = vld [vmem:[%s857_s24 + $0x1] sm:$0x1] (!%p515_p13) }
  0x54   : > { %227 = sbr.rel (%p515_p13) target bundleno = 99 (0x63), region = 44  ;;  %s516_s20 = smin.u32 (!%p515_p13), %s229_s17, %s223_s11 }
  0x55   : > { %s231_s25 = sand.u32 (!%p515_p13), 7, %s516_s20  }
  0x56   : > { %s232_s27 = ssub.s32 (!%p515_p13), 0, %s231_s25 }
  0x5b   : > { %s990_s27 = smov (!%p228_p1, %s232_s27), %s231_s25 }
  0x5c   : > { %p518_p4 = scmp.lt.s32.totalorder %s990_s27, 0  ;;  %s238_s26 = sadd.s32 8, %s990_s27 }
  0x5e   : > { %s992_s26 = smov (!%p518_p4, %s238_s26), %s990_s27 }
  0x5f   : > { %s240_s28 = ssub.s32 7, %s992_s26 }
  0x60   : > { %s241_s4 = scalar_lea.vmem [#allocation6], %s240_s28 }
  0x61   : > { %v242_v4 = vld [vmem:[%s241_s4] sm:$0x1] }
  0x62   : > { %243 = vst [vmem:[%s859_s29 + $0x1] sm:$0x1] %v242_v4  ;;  %245 = vst [vmem:[%s241_s4] sm:$0x1] %v244_v3 }
  0x63 PF: > { %s246_s5 = sadd.s32 2, %s864_s30 }
  0x64   : > { %p519_p7 = scmp.ge.s32.totalorder %s246_s5, 10 }
  0x65   : > { %p251_p8 = scmp.lt.s32.totalorder (!%p519_p7), %s246_s5, 0  ;;  %s252_s6 = ssub.s32 (!%p519_p7), 0, %s246_s5  ;;  %v267_v5 = vld [vmem:[%s857_s24 + $0x2] sm:$0x1] (!%p519_p7) }
  0x66   : > { %250 = sbr.rel (%p519_p7) target bundleno = 117 (0x75), region = 48  ;;  %s520_s7 = smin.u32 (!%p519_p7), %s252_s6, %s246_s5 }
  0x67   : > { %s254_s8 = sand.u32 (!%p519_p7), 7, %s520_s7  }
  0x68   : > { %s255_s9 = ssub.s32 (!%p519_p7), 0, %s254_s8 }
  0x6d   : > { %s994_s9 = smov (!%p251_p8, %s255_s9), %s254_s8 }
  0x6e   : > { %p522_p12 = scmp.lt.s32.totalorder %s994_s9, 0  ;;  %s261_s10 = sadd.s32 8, %s994_s9 }
  0x70   : > { %s996_s10 = smov (!%p522_p12, %s261_s10), %s994_s9 }
  0x71   : > { %s263_s11 = ssub.s32 7, %s996_s10 }
  0x72   : > { %s264_s17 = scalar_lea.vmem [#allocation6], %s263_s11 }
  0x73   : > { %v265_v6 = vld [vmem:[%s264_s17] sm:$0x1] }
  0x74   : > { %266 = vst [vmem:[%s859_s29 + $0x2] sm:$0x1] %v265_v6  ;;  %268 = vst [vmem:[%s264_s17] sm:$0x1] %v267_v5 }
  0x75 PF: > { %s269_s20 = sadd.s32 3, %s864_s30 }
  0x76   : > { %p523_p0 = scmp.ge.s32.totalorder %s269_s20, 10 }
  0x77   : > { %p274_p3 = scmp.lt.s32.totalorder (!%p523_p0), %s269_s20, 0  ;;  %s275_s25 = ssub.s32 (!%p523_p0), 0, %s269_s20  ;;  %v290_v7 = vld [vmem:[%s857_s24 + $0x3] sm:$0x1] (!%p523_p0) }
  0x78   : > { %273 = sbr.rel (%p523_p0) target bundleno = 135 (0x87), region = 52  ;;  %s524_s27 = smin.u32 (!%p523_p0), %s275_s25, %s269_s20 }
  0x79   : > { %s277_s26 = sand.u32 (!%p523_p0), 7, %s524_s27  }
  0x7a   : > { %s278_s28 = ssub.s32 (!%p523_p0), 0, %s277_s26 }
  0x7f   : > { %s998_s28 = smov (!%p274_p3, %s278_s28), %s277_s26 }
  0x80   : > { %p526_p2 = scmp.lt.s32.totalorder %s998_s28, 0  ;;  %s284_s4 = sadd.s32 8, %s998_s28 }
  0x82   : > { %s1000_s4 = smov (!%p526_p2, %s284_s4), %s998_s28 }
  0x83   : > { %s286_s5 = ssub.s32 7, %s1000_s4 }
  0x84   : > { %s287_s6 = scalar_lea.vmem [#allocation6], %s286_s5 }
  0x85   : > { %v288_v8 = vld [vmem:[%s287_s6] sm:$0x1] }
  0x86   : > { %289 = vst [vmem:[%s859_s29 + $0x3] sm:$0x1] %v288_v8  ;;  %291 = vst [vmem:[%s287_s6] sm:$0x1] %v290_v7 }
  0x87 PF: > { %s292_s7 = sadd.s32 4, %s864_s30 }
  0x88   : > { %p527_p5 = scmp.ge.s32.totalorder %s292_s7, 10 }
  0x89   : > { %p297_p6 = scmp.lt.s32.totalorder (!%p527_p5), %s292_s7, 0  ;;  %s298_s8 = ssub.s32 (!%p527_p5), 0, %s292_s7  ;;  %v313_v9 = vld [vmem:[%s857_s24 + $0x4] sm:$0x1] (!%p527_p5) }
  0x8a   : > { %296 = sbr.rel (%p527_p5) target bundleno = 153 (0x99), region = 56  ;;  %s528_s9 = smin.u32 (!%p527_p5), %s298_s8, %s292_s7 }
  0x8b   : > { %s300_s10 = sand.u32 (!%p527_p5), 7, %s528_s9  }
  0x8c   : > { %s301_s11 = ssub.s32 (!%p527_p5), 0, %s300_s10 }
  0x91   : > { %s1002_s11 = smov (!%p297_p6, %s301_s11), %s300_s10 }
  0x92   : > { %p530_p9 = scmp.lt.s32.totalorder %s1002_s11, 0  ;;  %s307_s17 = sadd.s32 8, %s1002_s11 }
  0x94   : > { %s1004_s17 = smov (!%p530_p9, %s307_s17), %s1002_s11 }
  0x95   : > { %s309_s20 = ssub.s32 7, %s1004_s17 }
  0x96   : > { %s310_s25 = scalar_lea.vmem [#allocation6], %s309_s20 }
  0x97   : > { %v311_v10 = vld [vmem:[%s310_s25] sm:$0x1] }
  0x98   : > { %312 = vst [vmem:[%s859_s29 + $0x4] sm:$0x1] %v311_v10  ;;  %314 = vst [vmem:[%s310_s25] sm:$0x1] %v313_v9 }
  0x99 PF: > { %s315_s27 = sadd.s32 5, %s864_s30 }
  0x9a   : > { %p531_p10 = scmp.ge.s32.totalorder %s315_s27, 10 }
  0x9b   : > { %p320_p11 = scmp.lt.s32.totalorder (!%p531_p10), %s315_s27, 0  ;;  %s321_s26 = ssub.s32 (!%p531_p10), 0, %s315_s27  ;;  %v336_v11 = vld [vmem:[%s857_s24 + $0x5] sm:$0x1] (!%p531_p10) }
  0x9c   : > { %319 = sbr.rel (%p531_p10) target bundleno = 171 (0xab), region = 60  ;;  %s532_s28 = smin.u32 (!%p531_p10), %s321_s26, %s315_s27 }
  0x9d   : > { %s323_s4 = sand.u32 (!%p531_p10), 7, %s532_s28  }
  0x9e   : > { %s324_s5 = ssub.s32 (!%p531_p10), 0, %s323_s4 }
  0xa3   : > { %s1006_s5 = smov (!%p320_p11, %s324_s5), %s323_s4 }
  0xa4   : > { %p534_p13 = scmp.lt.s32.totalorder %s1006_s5, 0  ;;  %s330_s6 = sadd.s32 8, %s1006_s5 }
  0xa6   : > { %s1008_s6 = smov (!%p534_p13, %s330_s6), %s1006_s5 }
  0xa7   : > { %s332_s7 = ssub.s32 7, %s1008_s6 }
  0xa8   : > { %s333_s8 = scalar_lea.vmem [#allocation6], %s332_s7 }
  0xa9   : > { %v334_v12 = vld [vmem:[%s333_s8] sm:$0x1] }
  0xaa   : > { %335 = vst [vmem:[%s859_s29 + $0x5] sm:$0x1] %v334_v12  ;;  %337 = vst [vmem:[%s333_s8] sm:$0x1] %v336_v11 }
  0xab PF: > { %s338_s9 = sadd.s32 6, %s864_s30 }
  0xac   : > { %p535_p1 = scmp.ge.s32.totalorder %s338_s9, 10 }
  0xad   : > { %p343_p4 = scmp.lt.s32.totalorder (!%p535_p1), %s338_s9, 0  ;;  %s344_s10 = ssub.s32 (!%p535_p1), 0, %s338_s9  ;;  %v359_v13 = vld [vmem:[%s857_s24 + $0x6] sm:$0x1] (!%p535_p1) }
  0xae   : > { %342 = sbr.rel (%p535_p1) target bundleno = 189 (0xbd), region = 64  ;;  %s536_s11 = smin.u32 (!%p535_p1), %s344_s10, %s338_s9 }
  0xaf   : > { %s346_s17 = sand.u32 (!%p535_p1), 7, %s536_s11  }
  0xb0   : > { %s347_s20 = ssub.s32 (!%p535_p1), 0, %s346_s17 }
  0xb5   : > { %s1010_s20 = smov (!%p343_p4, %s347_s20), %s346_s17 }
  0xb6   : > { %p538_p7 = scmp.lt.s32.totalorder %s1010_s20, 0  ;;  %s353_s25 = sadd.s32 8, %s1010_s20 }
  0xb8   : > { %s1012_s25 = smov (!%p538_p7, %s353_s25), %s1010_s20 }
  0xb9   : > { %s355_s27 = ssub.s32 7, %s1012_s25 }
  0xba   : > { %s356_s26 = scalar_lea.vmem [#allocation6], %s355_s27 }
  0xbb   : > { %v357_v14 = vld [vmem:[%s356_s26] sm:$0x1] }
  0xbc   : > { %358 = vst [vmem:[%s859_s29 + $0x6] sm:$0x1] %v357_v14  ;;  %360 = vst [vmem:[%s356_s26] sm:$0x1] %v359_v13 }
  0xbd PF: > { %s361_s28 = sadd.s32 7, %s864_s30 }
  0xbe   : > { %p539_p8 = scmp.ge.s32.totalorder %s361_s28, 10 }
  0xbf   : > { %p366_p12 = scmp.lt.s32.totalorder (!%p539_p8), %s361_s28, 0  ;;  %s367_s4 = ssub.s32 (!%p539_p8), 0, %s361_s28  ;;  %v382_v15 = vld [vmem:[%s857_s24 + $0x7] sm:$0x1] (!%p539_p8) }
  0xc0   : > { %365 = sbr.rel (%p539_p8) target bundleno = 207 (0xcf), region = 68  ;;  %s540_s5 = smin.u32 (!%p539_p8), %s367_s4, %s361_s28 }
  0xc1   : > { %s369_s6 = sand.u32 (!%p539_p8), 7, %s540_s5  }
  0xc2   : > { %s370_s7 = ssub.s32 (!%p539_p8), 0, %s369_s6 }
  0xc7   : > { %s1014_s7 = smov (!%p366_p12, %s370_s7), %s369_s6 }
  0xc8   : > { %p542_p0 = scmp.lt.s32.totalorder %s1014_s7, 0  ;;  %s376_s8 = sadd.s32 8, %s1014_s7 }
  0xca   : > { %s1016_s8 = smov (!%p542_p0, %s376_s8), %s1014_s7 }
  0xcb   : > { %s378_s9 = ssub.s32 7, %s1016_s8 }
  0xcc   : > { %s379_s10 = scalar_lea.vmem [#allocation6], %s378_s9 }
  0xcd   : > { %v380_v16 = vld [vmem:[%s379_s10] sm:$0x1] }
  0xce   : > { %381 = vst [vmem:[%s859_s29 + $0x7] sm:$0x1] %v380_v16  ;;  %383 = vst [vmem:[%s379_s10] sm:$0x1] %v382_v15 }
  0xcf PF: > { %s544_s30 = sshll.u32 %s784_s16, 7  ;;  %s398_s25 = sshll.u32 %s859_s29, 4  ;;  %s399_s25 = int_to_ptr.vmem [resolvable:$true] %s398_s25 }
  0xd0   : > { %s897_s20 = scalar_lea.hbm %s960_s2, %s544_s30  ;;  %s385_s27 = scalar_lea.sflag [#allocation4], %s171_s19 }
  0xd1   : > { %s638_s24 = scalar_lea.vmem %s399_s25, 128  ;;  %p974_p2 = scmp.ne.s32.totalorder %s966_s22, 0 }
  0xd2   : > { %p639_p3 = scmp.ne.s32.totalorder %s399_s25, %s638_s24  ;;  %s739_s26 = smov [#allocation5]  }
  0xd3   : > { %s642_s28 = sshll.u32 %s739_s26, 4  ;;  %s643_s28 = int_to_ptr.vmem [resolvable:$false] %s642_s28 }
  0xd4   : > { %p640_p5 = pnand %p639_p3, %p974_p2  ;;  %s644_s4 = scalar_lea.vmem %s643_s28, 256 }
  0xd5   : > { %p645_p9 = scmp.lt.s32.totalorder %s399_s25, %s643_s28  ;;  %p646_p10 = scmp.lt.s32.totalorder %s644_s4, %s638_s24 }
  0xd6   : > { %p641_p6 = pneg %p640_p5 }
  0xd7   : > { %p647_p11 = por %p646_p10, %p645_p9 }
  0xd9   : > { %p648_p13 = pnand %p647_p11, %p641_p6 }
  0xdb   : > { %651 = shalt.err (!%p648_p13)
}
  0xdc   : > { %s652_s19 = scalar_lea.hbm %s897_s20, 128  ;;  %s656_s6 = scalar_lea.hbm %s960_s2, 256 }
  0xdd   : > { %p653_p1 = scmp.ne.s32.totalorder %s897_s20, %s652_s19  ;;  %p657_p8 = scmp.lt.u32.totalorder %s897_s20, %s960_s2 }
  0xde   : > { %p658_p12 = scmp.lt.u32.totalorder %s656_s6, %s652_s19  ;;  %p660_p3 = scmp.lt.u32.totalorder %s652_s19, %s897_s20 }
  0xdf   : > { %p654_p4 = pnand %p653_p1, %p974_p2 }
  0xe0   : > { %p659_p0 = por %p658_p12, %p657_p8 }
  0xe1   : > { %p655_p7 = pneg %p654_p4 }
  0xe2   : > { %p661_p5 = por %p660_p3, %p659_p0 }
  0xe4   : > { %p662_p6 = pnand %p661_p5, %p655_p7 }
  0xe6   : > { %665 = shalt.err (!%p662_p6)
}
  0xe7   : > { %553 = dma.vmem_to_hbm [thread:$0]  (%p974_p2), %s399_s25, 128, %s897_s20, %s385_s27  }
  0xe8   : > { %s740_s9 = smov [#allocation6]   ;;  %p975_p10 = scmp.eq.s32.totalorder %s784_s16, 1 }
  0xe9   : > { %s408_s10 = sshll.u32 %s740_s9, 4  ;;  %s409_s10 = int_to_ptr.vmem [resolvable:$true] %s408_s10 }
  0xea   : > { %s666_s30 = scalar_lea.vmem %s409_s10, 128  ;;  %p673_p1 = scmp.lt.s32.totalorder %s409_s10, %s409_s10 }
  0xeb   : > { %p667_p9 = scmp.ne.s32.totalorder %s409_s10, %s666_s30  ;;  %p674_p4 = scmp.lt.s32.totalorder %s666_s30, %s666_s30 }
  0xed   : > { %p668_p11 = pnand %p667_p9, %p975_p10  ;;  %p675_p8 = por %p674_p4, %p673_p1 }
  0xef   : > { %p669_p13 = pneg %p668_p11 }
  0xf1   : > { %p676_p12 = pnand %p675_p8, %p669_p13 }
  0xf3   : > { %679 = shalt.err (!%p676_p12)
}
  0xf4   : > { %s680_s22 = scalar_lea.hbm %s961_s3, 128  ;;  %p976_p7 = pmov %p975_p10 }
  0xf5   : > { %p681_p2 = scmp.ne.s32.totalorder %s961_s3, %s680_s22  ;;  %p686_p5 = scmp.lt.u32.totalorder %s680_s22, %s961_s3 }
  0xf7   : > { %p682_p0 = pnand %p681_p2, %p976_p7 }
  0xf9   : > { %p683_p3 = pneg %p682_p0 }
  0xfb   : > { %p688_p6 = pnand %p686_p5, %p683_p3 }
  0xfd   : > { %691 = shalt.err (!%p688_p6)
}
  0xfe   : > { %s741_s26 = smov 16   ;;  %s742_s28 = smov 1  }
  0xff   : > { %p977_p9 = pmov %p976_p7  ;;  %p978_p10 = pmov %p976_p7 }
 0x101   : > { %555 = dma.vmem_to_hbm [thread:$0]  (%p977_p9), %s409_s10, 128, %s961_s3, [#allocation7], %s741_s26, %s741_s26, %s742_s28  }
 0x102   : > { %713 = dma.done.wait (%p978_p10), [#allocation7], 128   ;;  %p979_p11 = pmov %p976_p7 }
 0x104   : > { %715 = vsyncadd (%p979_p11), [#allocation7], 4294967168 }
 0x105 PF: > { %p571_p13 = scmp.ge.s32.totalorder %s734_s15, 2  ;;  %s427_s29 = sand.u32 1, %s722_s12  }
 0x106   : > { %p980_p1 = scmp.ne.s32.totalorder %s967_s23, 0  ;;  %s428_s5 = scalar_lea.sflag [#allocation4], %s427_s29 }
 0x108   : > { %p564_p4 = pnand %p571_p13, %p980_p1 }
 0x10a   : > { %717 = dma.done.wait (!%p564_p4), %s428_s5, 128  }
 0x10b   : > { %719 = vsyncadd (!%p564_p4), %s428_s5, 4294967168  ;;  %p16_p8 = scmp.ge.s32.totalorder %s788_s18, 4   ;;  %s981_s12 = smov %s726_s13 }
 0x10c   : > { %s982_s13 = smov %s730_s14  ;;  %s983_s14 = smov %s799_s21 }
 0x10d   : > { %s984_s15 = smov %s788_s18  ;;  %18 = sbr.rel (!%p16_p8) target bundleno = 5 (0x5), region = 120 }
 0x114   :  { %433 = vsyncpa [#allocation3], 1 }
 0x115   :  { %435 = vsyncpa [#allocation3 + $0x1], 1 }
 0x116   :  { %436 = vsyncpa [#allocation4], 1 }
 0x117   :  { %438 = vsyncpa [#allocation4 + $0x1], 1 }
 0x118   :  { %439 = vsyncpa [#allocation7], 1 }

</bundles_post_ra>
